<compile_context>
chip_gen: v7x
topology: tpu7x:2x2x1
jax: 0.10.0
libtpu: 0.0.40
codegen_flags: <defaults>
</compile_context>

<pallas_src>
import functools

import jax
import jax.numpy as jnp
import numpy as np
from jax.experimental import pallas as pl
from jax.experimental.pallas import tpu as pltpu


# ~2 MiB per block: with double-buffered input + output (~4 live block
# buffers) this stays under v5e's 16 MiB scoped-VMEM default and v7x's 32 MiB,
# while being large enough to reach ~85% of HBM roofline on elementwise work.
_TARGET_BLOCK_BYTES = 2 * 1024 * 1024


def _round_up(x: int, m: int) -> int:
    return ((x + m - 1) // m) * m


def _scale_kernel(x_ref, s_ref, o_ref, *, normalize: bool):
    x = x_ref[...]                                    # (row_tile, T_pad)
    # Keep bf16 in bf16 (native on v6e/v7x); everything else widens to f32.
    compute_dtype = x.dtype if x.dtype == jnp.bfloat16 else jnp.float32
    x = x.astype(compute_dtype)
    s = s_ref[...].astype(compute_dtype)              # (1, T_pad), broadcasts

    if normalize:
        # Denominator math in f32; it is only (row_tile, 1).
        amax = jnp.max(jnp.abs(x).astype(jnp.float32), axis=-1, keepdims=True)
        denom = jnp.maximum(amax, jnp.float32(0.05))
        # Exact reciprocal (approx=False keeps results within 1e-5 of a true
        # divide); hot path becomes a plain broadcast multiply on the VPU.
        inv = pl.reciprocal(denom, approx=False).astype(compute_dtype)
        x = x * inv

    o_ref[...] = (s * x).astype(o_ref.dtype)


def _make_scale_rate(scales, fractions, length):
    """Reproduce torch.cat([torch.linspace(...)...]) exactly (numpy, static)."""
    if len(scales) == 1:
        return np.full((length,), scales[0], dtype=np.float32)
    fr = [d / sum(fractions) for d in fractions]
    transition_length = [int(length * d) for d in fr[:-1]] if len(fr) > 0 else []
    transition_length.append(length - sum(transition_length))
    segs = [
        np.linspace(s, t, l, dtype=np.float32)
        for s, t, l in zip(scales[:-1], scales[1:], transition_length)
    ]
    return np.concatenate(segs, axis=0).astype(np.float32)


def _choose_tiling(rows, t_pad, itemsize, sublane):
    """Largest row tile within the per-block VMEM budget; >=2 grid steps when possible."""
    rows_min = _round_up(rows, sublane)
    budget_rows = max(
        sublane, (_TARGET_BLOCK_BYTES // (t_pad * itemsize)) // sublane * sublane
    )
    row_tile = min(budget_rows, rows_min)
    # If everything fits in one block but we have >= 2 sublane-groups of rows,
    # split into two blocks so both v7x TensorCores get work.
    if row_tile >= rows_min and rows_min >= 2 * sublane:
        row_tile = _round_up((rows_min + 1) // 2, sublane)
    rows_pad = _round_up(rows, row_tile)
    return row_tile, rows_pad


def multi_point_scale(x, scales, fractions, normalize=False):
    """x: [..., T] float array. Returns scale_rate * (optionally normalized) x."""
    assert len(scales) == len(fractions) + 1
    orig_shape = x.shape
    T = orig_shape[-1]
    rows = int(np.prod(orig_shape[:-1])) if len(orig_shape) > 1 else 1
    x2 = x.reshape(rows, T)

    itemsize = np.dtype(x.dtype).itemsize
    sublane = 16 if x.dtype == jnp.bfloat16 else 8

    # Lane-dense output stores: pad T to a multiple of 128.  Zero padding is
    # safe: padded columns can't raise the abs-max and are sliced away.
    T_pad = _round_up(T, 128)
    row_tile, rows_pad = _choose_tiling(rows, T_pad, itemsize, sublane)
    # TODO(synk): for extremely long T where even an 8-row block exceeds VMEM,
    # restructure with T as an "arbitrary" reduction axis + running-abs-max
    # scratch (two-pass); not needed for typical waveform lengths.

    if rows_pad != rows or T_pad != T:
        x2 = jnp.pad(x2, ((0, rows_pad - rows), (0, T_pad - T)))

    scale_rate = _make_scale_rate(scales, fractions, T)
    scale_rate = np.pad(scale_rate, (0, T_pad - T)).reshape(1, T_pad)
    scale_rate = jnp.asarray(scale_rate, dtype=jnp.float32)

    grid = (rows_pad // row_tile,)

    cost = pl.CostEstimate(
        flops=3 * rows_pad * T_pad,
        transcendentals=0,
        bytes_accessed=2 * rows_pad * T_pad * itemsize,
    )

    out = pl.pallas_call(
        functools.partial(_scale_kernel, normalize=normalize),
        out_shape=jax.ShapeDtypeStruct((rows_pad, T_pad), x.dtype),
        grid_spec=pltpu.PrefetchScalarGridSpec(
            num_scalar_prefetch=0,
            grid=grid,
            in_specs=[
                pl.BlockSpec((row_tile, T_pad), lambda i: (i, 0)),
                pl.BlockSpec((1, T_pad), lambda i: (0, 0)),
            ],
            out_specs=pl.BlockSpec((row_tile, T_pad), lambda i: (i, 0)),
        ),
        compiler_params=pltpu.CompilerParams(
            dimension_semantics=("parallel",),
        ),
        cost_estimate=cost,
    )(x2, scale_rate)

    out = out[:rows, :T]
    return out.reshape(orig_shape)


def _reference(x, scales, fractions, normalize):
    """Pure numpy reference mirroring the PyTorch forward."""
    x = np.asarray(x, dtype=np.float32).copy()
    T = x.shape[-1]
    fr = [d / sum(fractions) for d in fractions] if len(fractions) > 0 else []
    transition_length = [int(T * d) for d in fr[:-1]] if len(fr) > 0 else []
    transition_length.append(T - sum(transition_length))
    if len(scales) > 1:
        scale_rate = np.concatenate(
            [np.linspace(s, t, l, dtype=np.float32)
             for s, t, l in zip(scales[:-1], scales[1:], transition_length)]
        )
    else:
        scale_rate = np.float32(scales[0])
    if normalize:
        denom = np.maximum(np.max(np.abs(x), axis=-1, keepdims=True), 0.05)
        x = x / denom
    return scale_rate * x


if __name__ == "__main__":
    # Module "parameters" (deterministic, in-script).
    scales = [1.0, 0.25, 2.0]
    fractions = [1.0, 3.0]

    key = jax.random.PRNGKey(0)
    k1, k2 = jax.random.split(key)

    # Case 1: aligned shapes, normalize=True.  [B, C, T] waveform-style input.
    B, C, T = 2, 4, 256
    x = jax.random.normal(k1, (B, C, T), dtype=jnp.float32)
    y = jax.block_until_ready(multi_point_scale(x, scales, fractions, normalize=True))
    np.testing.assert_allclose(
        np.asarray(y), _reference(np.asarray(x), scales, fractions, True),
        rtol=1e-5, atol=1e-5,
    )

    # Case 2: unaligned rows/T (exercises padding paths), normalize=False.
    B2, C2, T2 = 3, 2, 200
    x2 = jax.random.normal(k2, (B2, C2, T2), dtype=jnp.float32)
    y2 = jax.block_until_ready(multi_point_scale(x2, scales, fractions, normalize=False))
    np.testing.assert_allclose(
        np.asarray(y2), _reference(np.asarray(x2), scales, fractions, False),
        rtol=1e-5, atol=1e-5,
    )

    print("KERNEL_OK")
</pallas_src>

<mosaic_0001>
module attributes {stable_mosaic.version = 11 : i64} {
  func.func @_scale_kernel(%arg0: i32, %arg1: memref<8x256xf32, #tpu.memory_space<vmem>>, %arg2: memref<1x256xf32, #tpu.memory_space<vmem>>, %arg3: memref<8x256xf32, #tpu.memory_space<vmem>>) attributes {dimension_semantics = [#tpu.dimension_semantics<parallel>], iteration_bounds = array<i64: 1>, scalar_prefetch = 0 : i64, scratch_operands = 0 : i64, tpu.core_type = #tpu.core_type<tc>, window_params = [{transform_indices = @transform_0, window_bounds = array<i64: 8, 256>}, {pipeline_mode = #tpu.pipeline_mode<synchronous>, transform_indices = @transform_1, window_bounds = array<i64: 1, 256>}, {transform_indices = @transform_2, window_bounds = array<i64: 8, 256>}]} {
    %c0 = arith.constant 0 : index
    %c0_0 = arith.constant 0 : index
    %0 = vector.load %arg1[%c0, %c0_0] : memref<8x256xf32, #tpu.memory_space<vmem>>, vector<8x256xf32>
    %c0_1 = arith.constant 0 : index
    %c0_2 = arith.constant 0 : index
    %1 = vector.load %arg2[%c0_1, %c0_2] : memref<1x256xf32, #tpu.memory_space<vmem>>, vector<1x256xf32>
    %2 = math.absf %0 : vector<8x256xf32>
    %cst = arith.constant dense<0xFF800000> : vector<8xf32>
    %3 = vector.multi_reduction <maximumf>, %2, %cst [1] : vector<8x256xf32> to vector<8xf32>
    %4 = vector.shape_cast %3 : vector<8xf32> to vector<8x1xf32>
    %cst_3 = arith.constant 5.000000e-02 : f32
    %5 = vector.broadcast %cst_3 : f32 to vector<8x1xf32>
    %6 = arith.maximumf %4, %5 : vector<8x1xf32>
    %7 = tpu.reciprocal %6 : vector<8x1xf32> -> vector<8x1xf32>
    %8 = vector.broadcast %7 : vector<8x1xf32> to vector<8x256xf32>
    %9 = arith.mulf %0, %8 : vector<8x256xf32>
    %10 = vector.broadcast %1 : vector<1x256xf32> to vector<8x256xf32>
    %11 = arith.mulf %10, %9 : vector<8x256xf32>
    %c0_4 = arith.constant 0 : index
    %c0_5 = arith.constant 0 : index
    %12 = vector.load %arg3[%c0_4, %c0_5] : memref<8x256xf32, #tpu.memory_space<vmem>>, vector<8x256xf32>
    tpu.vector_store %arg3[%c0_4, %c0_5], %11 {strides = array<i32>} : memref<8x256xf32, #tpu.memory_space<vmem>>, vector<8x256xf32>,
    return
  }
  func.func @transform_0(%arg0: i32) -> (i32, i32) {
    %c0_i32 = arith.constant 0 : i32
    %c0_i32_0 = arith.constant 0 : i32
    return %arg0, %c0_i32 : i32, i32
  }
  func.func @transform_1(%arg0: i32) -> (i32, i32) {
    %c0_i32 = arith.constant 0 : i32
    %c0_i32_0 = arith.constant 0 : i32
    %c0_i32_1 = arith.constant 0 : i32
    return %c0_i32, %c0_i32_0 : i32, i32
  }
  func.func @transform_2(%arg0: i32) -> (i32, i32) {
    %c0_i32 = arith.constant 0 : i32
    %c0_i32_0 = arith.constant 0 : i32
    return %arg0, %c0_i32 : i32, i32
  }
}

</mosaic_0001>

<bundles_post_ra>
// kernel: tpu_custom_call.1
= control target key start
LH: loop header
LB: loop body
LE: loop exit
PB: predicated region body
PF: predicated region fallthrough
CT: control target
= control target key end

     0   :  { %7 = vsyncpa [#allocation3], 0  ;;  %s162_s0 = inlined_call_operand.hbm [shape: f32[8,256], index: 0, kind: input, shape index: {}]   ;;  %s163_s1 = inlined_call_operand.vmem [shape: f32[1,256], index: 1, kind: input, shape index: {}]   ;;  %s164_s2 = inlined_call_operand.hbm [shape: f32[8,256], index: 2, kind: output, shape index: {}]  }
   0x1   :  { %8 = vsyncpa [#allocation4], 0  ;;  %s118_s9 = smov [#allocation2]   ;;  %s70_s13 = scalar_lea.hbm %s162_s0, 256 }
   0x2   :  { %s15_s10 = sshll.u32 %s118_s9, 4  ;;  %p71_p0 = scmp.ne.s32.totalorder %s162_s0, %s70_s13  ;;  %s16_s10 = int_to_ptr.vmem [resolvable:$true] %s15_s10 }
   0x3   :  { %p74_p1 = scmp.lt.u32.totalorder %s70_s13, %s162_s0 }
   0x5   :  { %p76_p2 = pnand %p74_p1, %p71_p0 }
   0x7   :  { %79 = shalt.err (!%p76_p2)
}
   0x8   :  { %s80_s18 = scalar_lea.vmem %s16_s10, 256  ;;  %p85_p4 = scmp.lt.s32.totalorder %s16_s10, %s16_s10 }
   0x9   :  { %p81_p3 = scmp.ne.s32.totalorder %s16_s10, %s80_s18  ;;  %p86_p5 = scmp.lt.s32.totalorder %s80_s18, %s80_s18 }
   0xb   :  { %p87_p6 = por %p86_p5, %p85_p4 }
   0xd   :  { %p88_p7 = pnand %p87_p6, %p81_p3 }
   0xf   :  { %91 = shalt.err (!%p88_p7)
}
  0x10   :  { %18 = dma.hbm_to_vmem [thread:$0]  %s162_s0, 256, %s16_s10, [#allocation3]  }
  0x11   :  { %114 = dma.done.wait [#allocation3], 256  }
  0x12   :  { %115 = vsyncadd [#allocation3], 4294967040  ;;  %v24_v0 = vld [vmem:[#allocation2] sm:$0xff]  ;;  %v25_v1 = vld [vmem:[#allocation2 + $0x8] sm:$0xff]  ;;  %v37_v6 = vlaneseq  ;;  %s119_s0 = smov [#allocation5]  }
  0x13   :  { %v27_v2 = vand.u32 2147483647, %v24_v0  ;;  %v28_v3 = vand.u32 2147483647, %v25_v1  ;;  %v26_v11 = vld [vmem:[%s163_s1] sm:$0x3] }
  0x14   :  { %v38_v8 = vshrl.u32 %v37_v6, 7  ;;  %s57_s23 = sshll.u32 %s119_s0, 4  ;;  %s58_s23 = int_to_ptr.vmem [resolvable:$true] %s57_s23 }
  0x15   :  { %v29_v4 = vmax.f32.f32 %v27_v2, %v28_v3  ;;  %s92_s24 = scalar_lea.vmem %s58_s23, 256  ;;  %p97_p9 = scmp.lt.s32.totalorder %s58_s23, %s58_s23 }
  0x16   :  { %v39_v9 = vsub.s32 0, %v38_v8  ;;  %v43_v10 = vsub.s32 1, %v38_v8  ;;  %p93_p8 = scmp.ne.s32.totalorder %s58_s23, %s92_s24  ;;  %p98_p10 = scmp.lt.s32.totalorder %s92_s24, %s92_s24 }
  0x17   :  { %30 = vmax.xlane.f32.xlu0 %v29_v4 }
  0x18   :  { %v40_v12 = vrot.slane %v26_v11, %v39_v9  ;;  %v44_v13 = vrot.slane %v26_v11, %v43_v10  ;;  %p99_p11 = por %p98_p10, %p97_p9 }
  0x1a   :  { %p100_p12 = pnand %p99_p11, %p93_p8 }
  0xa4   :  { %v31_v5 = vpop.xlane.xlu0 %30 }
  0xa5   :  { %v32_v7 = vmax.f32 %v31_v5, 0.05 }
  0xa7   :  { %68 = vrcp.f32 %v32_v7 }
  0xb1   :  { %v69_v14 = vpop.eup %68 }
  0xb2   :  { %v34_v15 = vmul.f32 %v69_v14, %v24_v0  ;;  %v35_v16 = vmul.f32 %v69_v14, %v25_v1 }
  0xb4   :  { %v47_v17 = vmul.f32 %v40_v12, %v34_v15  ;;  %v48_v18 = vmul.f32 %v44_v13, %v35_v16 }
  0xb6   :  { %49 = vst [vmem:[#allocation5] sm:$0xff] %v47_v17  ;;  %50 = vst [vmem:[#allocation5 + $0x8] sm:$0xff] %v48_v18 }
  0xb7   :  { %103 = shalt.err (!%p100_p12)
}
  0xb8   :  { %s104_s26 = scalar_lea.hbm %s164_s2, 256 }
  0xb9   :  { %p105_p13 = scmp.ne.s32.totalorder %s164_s2, %s104_s26  ;;  %p108_p0 = scmp.lt.u32.totalorder %s104_s26, %s164_s2 }
  0xbb   :  { %p110_p1 = pnand %p108_p0, %p105_p13 }
  0xbd   :  { %113 = shalt.err (!%p110_p1)
}
  0xbe   :  { %60 = dma.vmem_to_hbm [thread:$0]  %s58_s23, 256, %s164_s2, [#allocation4]  }
  0xbf   :  { %116 = dma.done.wait [#allocation4], 256  }
  0xc0   :  { %117 = vsyncadd [#allocation4], 4294967040 }
  0xc1   :  { %64 = vsyncpa [#allocation3], 1 }
  0xc2   :  { %65 = vsyncpa [#allocation4], 1 }

</bundles_post_ra>
